<compile_context>
chip_gen: v6e
topology: v6e:2x2x1
jax: 0.10.0
libtpu: 0.0.40
codegen_flags: <defaults>
</compile_context>

<pallas_src>
import functools

import jax
import jax.numpy as jnp
from jax.experimental import pallas as pl
from jax.experimental.pallas import tpu as pltpu

IN_F = 164       # Linear1 in_features (fixed by the PyTorch spec)
HID_PAD = 128    # hidden (=32) padded to lane width
CLS_PAD = 128    # classes padded to lane width -> unmasked, lane-dense stores

# Packed parameter slab layout (rows x 128 lanes), all offsets 16-row aligned
# so sub-slices are tile-aligned views for both f32 (8-row) and bf16 (16-row)
# sublane tilings:
#   rows [0   : 164)  W1   (cols 0:32)
#   rows [164 : 176)  zero padding
#   rows [176 : 304)  W2   (rows 176:208 x cols 0:classes), rest zero
#   row   304         b1   (cols 0:32)
#   row   305         b2   (cols 0:classes)
#   rows [306 : 320)  zero padding
W2_START = 176
B1_ROW = 304
B2_ROW = 305
SLAB_ROWS = 320


def decoder_kernel(x_ref, p_ref, o_ref):
    """Fused  y = ReLU(x @ W1 + b1) @ W2 + b2  for one batch tile.

    2 MXU matmuls + 1 VPU max + 2 broadcast VPU adds; weights/biases come from
    a single VMEM-resident slab (constant index_map -> fetched once).
    """
    x = x_ref[...]                                    # (tb, 164)
    w1 = p_ref[0:IN_F, :]                             # (164, 128)
    w2 = p_ref[W2_START:W2_START + HID_PAD, :]        # (128, 128) aligned view
    b1 = p_ref[B1_ROW:B1_ROW + 1, :]                  # (1, 128)
    b2 = p_ref[B2_ROW:B2_ROW + 1, :]                  # (1, 128)

    h = jnp.dot(x, w1, preferred_element_type=jnp.float32) + b1.astype(jnp.float32)
    h = jnp.maximum(h, 0.0)                           # ReLU on the f32 accumulator
    h = h.astype(x.dtype)                             # bf16 path: cast for 2nd MXU pass
    out = jnp.dot(h, w2, preferred_element_type=jnp.float32) + b2.astype(jnp.float32)
    o_ref[...] = out.astype(o_ref.dtype)


def pack_decoder_params(w1, b1, w2, b2, dtype=jnp.float32):
    """Pack (W1, b1, W2, b2) into one contiguous (320, 128) slab (done once).

    Collapses 4 parameter DMAs into 1.  Lanes 32:128 of b1 and rows 32:128 of
    W2 are zero, so the lane padding contributes exactly 0 to the result.
    Pass dtype=jnp.bfloat16 for the reduced-precision path (f32 accumulation).
    """
    in_f, hid = w1.shape
    classes = w2.shape[1]
    assert in_f == IN_F
    assert hid <= HID_PAD and classes <= CLS_PAD

    slab = jnp.zeros((SLAB_ROWS, CLS_PAD), dtype)
    slab = slab.at[:in_f, :hid].set(w1.astype(dtype))
    slab = slab.at[W2_START:W2_START + hid, :classes].set(w2.astype(dtype))
    slab = slab.at[B1_ROW, :hid].set(b1.astype(dtype))
    slab = slab.at[B2_ROW, :classes].set(b2.astype(dtype))
    return slab


def _round_up(a, m):
    return (a + m - 1) // m * m


@functools.partial(jax.jit, static_argnames=("classes", "tile_b", "slice_output"))
def decoder_forward(x, params, *, classes, tile_b=512, slice_output=True):
    """x: (B, ...) with prod(trailing dims) == 164.  params: packed (320,128) slab.

    Returns (B, classes) float32 (PyTorch semantics), or the lane/batch padded
    (B8, 128) slab if slice_output=False (saves one post-kernel HBM pass).
    """
    B = x.shape[0]
    x2d = x.reshape(B, -1).astype(params.dtype)       # Flatten(1) (+ optional bf16 cast)
    assert x2d.shape[1] == IN_F, f"expected {IN_F} flattened features, got {x2d.shape[1]}"

    # Pad batch only to a multiple of 8 sublanes, and only when actually needed.
    B8 = _round_up(max(B, 1), 8)
    if B8 != B:
        x2d = jnp.pad(x2d, ((0, B8 - B), (0, 0)))

    # Large tiles amortize the ~0.35us per-grid-step overhead; cap so the grid
    # keeps >=4 steps at large B (lets the "parallel" axis use both v7x TCs).
    tb = min(tile_b, max(8, _round_up(pl.cdiv(B8, 4), 8)))
    grid = pl.cdiv(B8, tb)                            # ragged last tile is fine

    out = pl.pallas_call(
        decoder_kernel,
        out_shape=jax.ShapeDtypeStruct((B8, CLS_PAD), jnp.float32),
        grid=(grid,),
        in_specs=[
            pl.BlockSpec((tb, IN_F), lambda i: (i, 0)),          # unpadded activations
            pl.BlockSpec((SLAB_ROWS, CLS_PAD), lambda i: (0, 0)),  # VMEM-resident weights
        ],
        out_specs=pl.BlockSpec((tb, CLS_PAD), lambda i: (i, 0)),   # lane-dense output
        compiler_params=pltpu.CompilerParams(
            dimension_semantics=("parallel",),                     # batch tiles -> 2 TCs on v7x
        ),
    )(x2d, params)

    if slice_output:
        return out[:B, :classes]
    return out


def init_params(key, in_features=164, hidden_size=64, classes=10):
    """Deterministic init mimicking nn.Linear defaults (uniform +/- 1/sqrt(fan_in))."""
    h = hidden_size // 2
    k1, k2, k3, k4 = jax.random.split(key, 4)
    lim1 = 1.0 / jnp.sqrt(jnp.float32(in_features))
    lim2 = 1.0 / jnp.sqrt(jnp.float32(h))
    w1 = jax.random.uniform(k1, (in_features, h), jnp.float32, -lim1, lim1)
    b1 = jax.random.uniform(k2, (h,), jnp.float32, -lim1, lim1)
    w2 = jax.random.uniform(k3, (h, classes), jnp.float32, -lim2, lim2)
    b2 = jax.random.uniform(k4, (classes,), jnp.float32, -lim2, lim2)
    return w1, b1, w2, b2


if __name__ == "__main__":
    key = jax.random.PRNGKey(0)
    kx, kp = jax.random.split(key)

    B, C, L = 2, 4, 41          # Flatten(1) -> 164 features = Linear1 in_features
    classes, hidden_size = 10, 64
    x = jax.random.normal(kx, (B, C, L), dtype=jnp.float32)
    w1, b1, w2, b2 = init_params(kp, in_features=C * L, hidden_size=hidden_size, classes=classes)

    def ref_fwd(xin):
        return jnp.maximum(xin.reshape(xin.shape[0], -1) @ w1 + b1, 0.0) @ w2 + b2

    # f32 path, tiny batch (grid = 1).
    params = pack_decoder_params(w1, b1, w2, b2)
    out = jax.block_until_ready(decoder_forward(x, params, classes=classes))
    assert out.shape == (B, classes)
    assert jnp.allclose(out, ref_fwd(x), atol=1e-5, rtol=1e-5), "mismatch vs reference (B=2)"

    # Batched paths: grid > 1 (parallel batch tiles) and a ragged last tile (B=130).
    for B2 in (256, 130):
        xb = jax.random.normal(jax.random.PRNGKey(B2), (B2, C, L), dtype=jnp.float32)
        outb = jax.block_until_ready(decoder_forward(xb, params, classes=classes))
        assert outb.shape == (B2, classes)
        assert jnp.allclose(outb, ref_fwd(xb), atol=1e-4, rtol=1e-4), f"mismatch (B={B2})"

    # Optional bf16 weight/activation path (f32 accumulation) -- looser tolerance.
    params_bf16 = pack_decoder_params(w1, b1, w2, b2, dtype=jnp.bfloat16)
    outh = jax.block_until_ready(decoder_forward(x, params_bf16, classes=classes))
    assert outh.shape == (B, classes)
    assert jnp.allclose(outh, ref_fwd(x), atol=5e-2, rtol=5e-2), "mismatch (bf16 path)"

    print("KERNEL_OK")
</pallas_src>

<mosaic_0001>
module attributes {stable_mosaic.version = 11 : i64} {
  func.func @decoder_kernel(%arg0: i32, %arg1: memref<8x164xf32, #tpu.memory_space<vmem>>, %arg2: memref<320x128xf32, #tpu.memory_space<vmem>>, %arg3: memref<8x128xf32, #tpu.memory_space<vmem>>) attributes {dimension_semantics = [#tpu.dimension_semantics<parallel>], iteration_bounds = array<i64: 1>, scalar_prefetch = 0 : i64, scratch_operands = 0 : i64, tpu.core_type = #tpu.core_type<tc>, window_params = [{transform_indices = @transform_0, window_bounds = array<i64: 8, 164>}, {pipeline_mode = #tpu.pipeline_mode<synchronous>, transform_indices = @transform_1, window_bounds = array<i64: 320, 128>}, {transform_indices = @transform_2, window_bounds = array<i64: 8, 128>}]} {
    %c0 = arith.constant 0 : index
    %c0_0 = arith.constant 0 : index
    %0 = vector.load %arg1[%c0, %c0_0] : memref<8x164xf32, #tpu.memory_space<vmem>>, vector<8x164xf32>
    %c0_1 = arith.constant 0 : index
    %c0_2 = arith.constant 0 : index
    %1 = vector.load %arg2[%c0_1, %c0_2] : memref<320x128xf32, #tpu.memory_space<vmem>>, vector<164x128xf32>
    %c176 = arith.constant 176 : index
    %c0_3 = arith.constant 0 : index
    %2 = vector.load %arg2[%c176, %c0_3] : memref<320x128xf32, #tpu.memory_space<vmem>>, vector<128x128xf32>
    %c304 = arith.constant 304 : index
    %c0_4 = arith.constant 0 : index
    %3 = vector.load %arg2[%c304, %c0_4] : memref<320x128xf32, #tpu.memory_space<vmem>>, vector<1x128xf32>
    %c305 = arith.constant 305 : index
    %c0_5 = arith.constant 0 : index
    %4 = vector.load %arg2[%c305, %c0_5] : memref<320x128xf32, #tpu.memory_space<vmem>>, vector<1x128xf32>
    %cst = arith.constant dense<0.000000e+00> : vector<8x128xf32>
    %5 = tpu.matmul %0, %1, %cst {dimension_numbers = #tpu.dot_dimension_numbers<[1], [0], [0], [1], [0, 0, 1, 1], [], []>} : vector<8x164xf32>, vector<164x128xf32>, vector<8x128xf32> -> vector<8x128xf32>
    %6 = vector.broadcast %3 : vector<1x128xf32> to vector<8x128xf32>
    %7 = arith.addf %5, %6 : vector<8x128xf32>
    %cst_6 = arith.constant 0.000000e+00 : f32
    %8 = vector.broadcast %cst_6 : f32 to vector<8x128xf32>
    %9 = arith.maximumf %7, %8 : vector<8x128xf32>
    %cst_7 = arith.constant dense<0.000000e+00> : vector<8x128xf32>
    %10 = tpu.matmul %9, %2, %cst_7 {dimension_numbers = #tpu.dot_dimension_numbers<[1], [0], [0], [1], [0, 0, 1, 1], [], []>} : vector<8x128xf32>, vector<128x128xf32>, vector<8x128xf32> -> vector<8x128xf32>
    %11 = vector.broadcast %4 : vector<1x128xf32> to vector<8x128xf32>
    %12 = arith.addf %10, %11 : vector<8x128xf32>
    %c0_8 = arith.constant 0 : index
    %c0_9 = arith.constant 0 : index
    %13 = vector.load %arg3[%c0_8, %c0_9] : memref<8x128xf32, #tpu.memory_space<vmem>>, vector<8x128xf32>
    tpu.vector_store %arg3[%c0_8, %c0_9], %12 {strides = array<i32>} : memref<8x128xf32, #tpu.memory_space<vmem>>, vector<8x128xf32>,
    return
  }
  func.func @transform_0(%arg0: i32) -> (i32, i32) {
    %c0_i32 = arith.constant 0 : i32
    %c0_i32_0 = arith.constant 0 : i32
    return %arg0, %c0_i32 : i32, i32
  }
  func.func @transform_1(%arg0: i32) -> (i32, i32) {
    %c0_i32 = arith.constant 0 : i32
    %c0_i32_0 = arith.constant 0 : i32
    %c0_i32_1 = arith.constant 0 : i32
    return %c0_i32, %c0_i32_0 : i32, i32
  }
  func.func @transform_2(%arg0: i32) -> (i32, i32) {
    %c0_i32 = arith.constant 0 : i32
    %c0_i32_0 = arith.constant 0 : i32
    return %arg0, %c0_i32 : i32, i32
  }
}

</mosaic_0001>

<bundles_post_ra>
// kernel: decoder_forward.1
= control target key start
LH: loop header
LB: loop body
LE: loop exit
PB: predicated region body
PF: predicated region fallthrough
CT: control target
= control target key end

     0   :  { %7 = vsyncpa [#allocation3], 0  ;;  %s312_s9 = smov [#allocation2]   ;;  %s382_s0 = inlined_call_operand.vmem [shape: f32[8,164], index: 0, kind: input, shape index: {}]   ;;  %s383_s1 = inlined_call_operand.hbm [shape: f32[320,128], index: 1, kind: input, shape index: {}]   ;;  %s384_s2 = inlined_call_operand.vmem [shape: f32[8,128], index: 2, kind: output, shape index: {}]  }
   0x1   :  { %s15_s10 = sshll.u32 %s312_s9, 4  ;;  %s16_s10 = int_to_ptr.vmem [resolvable:$true] %s15_s10 }
   0x2   :  { %s298_s11 = scalar_lea.vmem %s16_s10, 5120  ;;  %p303_p1 = scmp.lt.s32.totalorder %s16_s10, %s16_s10 }
   0x3   :  { %p299_p0 = scmp.ne.s32.totalorder %s16_s10, %s298_s11  ;;  %p304_p2 = scmp.lt.s32.totalorder %s298_s11, %s298_s11 }
   0x5   :  { %p305_p3 = por %p304_p2, %p303_p1 }
   0x7   :  { %p306_p4 = pnand %p305_p3, %p299_p0 }
   0x9   :  { %309 = shalt.err (!%p306_p4)
}
   0xa   :  { %s313_s12 = smov 128   ;;  %s314_s13 = smov 8  }
   0xb   :  { %21 = dma.hbm_to_vmem [thread:$0]  %s383_s1, 5120, %s16_s10, [#allocation3], %s313_s12, %s313_s12, %s314_s13  }
   0xc   :  { %310 = dma.done.wait [#allocation3], 5120  }
   0xd   :  { %311 = vsyncadd [#allocation3], 4294962176  ;;  %v315_v0 = vmov 0.0   ;;  %v42_v1 = vld [vmem:[#allocation2 + $0x78] sm:$0xff]  ;;  %v41_v2 = vld [vmem:[#allocation2 + $0x70] sm:$0xff]  ;;  %vm70_vm0 = vcmask 293888  }
   0xe   :  { %78 = vmatprep.subr.mxu0 %v315_v0  ;;  %250 = vmatprep.subr.mxu1 %v315_v0  ;;  %v40_v3 = vld [vmem:[#allocation2 + $0x68] sm:$0xff]  ;;  %v39_v4 = vld [vmem:[#allocation2 + $0x60] sm:$0xff]  ;;  %v38_v5 = vld [vmem:[#allocation2 + $0x58] sm:$0xff]  ;;  %vm74_vm1 = vcmask 1043456   ;;  %vm316_vm2 = vmmov 0  }
   0xf   :  { %79 = vmatpush1.msra.mxu0 %v42_v1  ;;  %v26_v6 = vld [vmem:[%s382_s0 + $0x8] sm:$0xff]  ;;  %v37_v8 = vld [vmem:[#allocation2 + $0x50] sm:$0xff]  ;;  %v62_v9 = vld [vmem:[#allocation2 + $0x120] sm:$0xff]  ;;  %282 = vmatprep.mubr.msk.f32.mxu1 %vm316_vm2, %v315_v0 }
  0x10   :  { %80 = vmatprep.subr.mxu0 %v315_v0  ;;  %v63_v7 = vld [vmem:[#allocation2 + $0x128] sm:$0xff]  ;;  %231 = vmatprep.mubr.msk.f32.mxu0 %vm70_vm0, %v26_v6  ;;  %v61_v11 = vld [vmem:[#allocation2 + $0x118] sm:$0xff]  ;;  %v35_v12 = vld [vmem:[#allocation2 + $0x40] sm:$0xff] }
  0x11   :  { %81 = vmatpush1.msra.mxu0 %v41_v2  ;;  %251 = vmatpush3.msra.mxu1 %v63_v7  ;;  %v36_v10 = vld [vmem:[#allocation2 + $0x48] sm:$0xff]  ;;  %v60_v13 = vld [vmem:[#allocation2 + $0x110] sm:$0xff]  ;;  %v34_v14 = vld [vmem:[#allocation2 + $0x38] sm:$0xff] }
  0x12   :  { %82 = vmatprep.subr.mxu0 %v315_v0  ;;  %252 = vmatprep.subr.mxu1 %v315_v0  ;;  %v59_v15 = vld [vmem:[#allocation2 + $0x108] sm:$0xff]  ;;  %v33_v16 = vld [vmem:[#allocation2 + $0x30] sm:$0xff]  ;;  %v58_v17 = vld [vmem:[#allocation2 + $0x100] sm:$0xff] }
  0x13   :  { %83 = vmatpush1.msra.mxu0 %v40_v3  ;;  %253 = vmatpush3.msra.mxu1 %v62_v9  ;;  %v32_v18 = vld [vmem:[#allocation2 + $0x28] sm:$0xff]  ;;  %v57_v19 = vld [vmem:[#allocation2 + $0xf8] sm:$0xff]  ;;  %v31_v20 = vld [vmem:[#allocation2 + $0x20] sm:$0xff] }
  0x14   :  { %84 = vmatprep.subr.mxu0 %v315_v0  ;;  %254 = vmatprep.subr.mxu1 %v315_v0  ;;  %v56_v21 = vld [vmem:[#allocation2 + $0xf0] sm:$0xff]  ;;  %v30_v22 = vld [vmem:[#allocation2 + $0x18] sm:$0xff]  ;;  %v55_v23 = vld [vmem:[#allocation2 + $0xe8] sm:$0xff] }
  0x15   :  { %85 = vmatpush1.msra.mxu0 %v39_v4  ;;  %255 = vmatpush3.msra.mxu1 %v61_v11  ;;  %v29_v24 = vld [vmem:[#allocation2 + $0x10] sm:$0xff]  ;;  %v54_v25 = vld [vmem:[#allocation2 + $0xe0] sm:$0xff]  ;;  %v28_v26 = vld [vmem:[#allocation2 + $0x8] sm:$0xff] }
  0x16   :  { %86 = vmatprep.subr.mxu0 %v315_v0  ;;  %256 = vmatprep.subr.mxu1 %v315_v0  ;;  %v53_v27 = vld [vmem:[#allocation2 + $0xd8] sm:$0xff]  ;;  %v27_v28 = vld [vmem:[#allocation2] sm:$0xff]  ;;  %v52_v29 = vld [vmem:[#allocation2 + $0xd0] sm:$0xff] }
  0x17   :  { %87 = vmatpush1.msra.mxu0 %v38_v5  ;;  %257 = vmatpush3.msra.mxu1 %v60_v13  ;;  %v47_v30 = vld [vmem:[#allocation2 + $0xa0] sm:$0xf]  ;;  %v51_v31 = vld [vmem:[#allocation2 + $0xc8] sm:$0xff]  ;;  %v46_v32 = vld [vmem:[#allocation2 + $0x98] sm:$0xff] }
  0x18   :  { %88 = vmatprep.subr.mxu0 %v315_v0  ;;  %258 = vmatprep.subr.mxu1 %v315_v0  ;;  %v45_v33 = vld [vmem:[#allocation2 + $0x90] sm:$0xff]  ;;  %v44_v34 = vld [vmem:[#allocation2 + $0x88] sm:$0xff]  ;;  %v43_v35 = vld [vmem:[#allocation2 + $0x80] sm:$0xff] }
  0x19   :  { %89 = vmatpush1.msra.mxu0 %v37_v8  ;;  %259 = vmatpush3.msra.mxu1 %v59_v15  ;;  %v25_v36 = vld [vmem:[%s382_s0] sm:$0xff]  ;;  %v49_v38 = vld [vmem:[#allocation2 + $0xb8] sm:$0xff]  ;;  %v48_v39 = vld [vmem:[#allocation2 + $0xb0] sm:$0xff] }
  0x1a   :  { %90 = vmatprep.subr.mxu0 %v315_v0  ;;  %260 = vmatprep.subr.mxu1 %v315_v0  ;;  %v50_v37 = vld [vmem:[#allocation2 + $0xc0] sm:$0xff]  ;;  %v229_v40 = vld [vmem:[#allocation2 + $0x130] ss:$0 sm:$0xff]  ;;  %v232_v45 = vld [vmem:[#allocation2 + $0x131] ss:$0 sm:$0xff] }
  0x1b   :  { %91 = vmatpush1.msra.mxu0 %v36_v10  ;;  %261 = vmatpush3.msra.mxu1 %v58_v17 }
  0x1c   :  { %92 = vmatprep.subr.mxu0 %v315_v0  ;;  %262 = vmatprep.subr.mxu1 %v315_v0 }
  0x1d   :  { %93 = vmatpush1.msra.mxu0 %v35_v12  ;;  %263 = vmatpush3.msra.mxu1 %v57_v19 }
  0x1e   :  { %94 = vmatprep.subr.mxu0 %v315_v0  ;;  %264 = vmatprep.subr.mxu1 %v315_v0 }
  0x1f   :  { %95 = vmatpush1.msra.mxu0 %v34_v14  ;;  %265 = vmatpush3.msra.mxu1 %v56_v21 }
  0x20   :  { %96 = vmatprep.subr.mxu0 %v315_v0  ;;  %266 = vmatprep.subr.mxu1 %v315_v0 }
  0x21   :  { %97 = vmatpush1.msra.mxu0 %v33_v16  ;;  %267 = vmatpush3.msra.mxu1 %v55_v23 }
  0x22   :  { %98 = vmatprep.subr.mxu0 %v315_v0  ;;  %268 = vmatprep.subr.mxu1 %v315_v0 }
  0x23   :  { %99 = vmatpush1.msra.mxu0 %v32_v18  ;;  %269 = vmatpush3.msra.mxu1 %v54_v25 }
  0x24   :  { %100 = vmatprep.subr.mxu0 %v315_v0  ;;  %270 = vmatprep.subr.mxu1 %v315_v0 }
  0x25   :  { %101 = vmatpush1.msra.mxu0 %v31_v20  ;;  %271 = vmatpush3.msra.mxu1 %v53_v27 }
  0x26   :  { %102 = vmatprep.subr.mxu0 %v315_v0  ;;  %272 = vmatprep.subr.mxu1 %v315_v0 }
  0x27   :  { %103 = vmatpush1.msra.mxu0 %v30_v22  ;;  %273 = vmatpush3.msra.mxu1 %v52_v29 }
  0x28   :  { %104 = vmatprep.subr.mxu0 %v315_v0  ;;  %274 = vmatprep.subr.mxu1 %v315_v0 }
  0x29   :  { %105 = vmatpush1.msra.mxu0 %v29_v24  ;;  %275 = vmatpush3.msra.mxu1 %v51_v31 }
  0x2a   :  { %106 = vmatprep.subr.mxu0 %v315_v0  ;;  %276 = vmatprep.subr.mxu1 %v315_v0 }
  0x2b   :  { %107 = vmatpush1.msra.mxu0 %v28_v26  ;;  %277 = vmatpush3.msra.mxu1 %v50_v37 }
  0x2c   :  { %108 = vmatprep.subr.mxu0 %v315_v0  ;;  %278 = vmatprep.subr.mxu1 %v315_v0 }
  0x2d   :  { %109 = vmatpush1.msra.mxu0 %v27_v28  ;;  %279 = vmatpush3.msra.mxu1 %v49_v38 }
  0x2e   :  { %132 = vmatprep.subr.mxu0 %v315_v0  ;;  %280 = vmatprep.subr.mxu1 %v315_v0 }
  0x2f   :  { %230 = vmatpush2.msk.msra.mxu0 %vm74_vm1, %v47_v30  ;;  %281 = vmatpush3.msra.mxu1 %v48_v39 }
  0x30   :  { %134 = vmatprep.subr.mxu0 %v315_v0 }
  0x31   :  { %135 = vmatpush2.msra.mxu0 %v46_v32 }
  0x32   :  { %136 = vmatprep.subr.mxu0 %v315_v0 }
  0x33   :  { %137 = vmatpush2.msra.mxu0 %v45_v33 }
  0x34   :  { %138 = vmatprep.subr.mxu0 %v315_v0 }
  0x35   :  { %139 = vmatpush2.msra.mxu0 %v44_v34 }
  0x36   :  { %140 = vmatprep.subr.mxu0 %v315_v0 }
  0x37   :  { %141 = vmatpush2.msra.mxu0 %v43_v35 }
  0x38   :  { %143 = vmatmul.mubr.f32.vlgmr.msra.gmra.mxu0 %v25_v36 }
  0xf8   :  { %v144_v41 = vpop.f32.mrf.mxu0 }
  0xf9   :  { %v145_v42 = vadd.f32 %v229_v40, %v144_v41 }
  0xfa   :  { %v146_v43 = vpop.f32.mrf.mxu0 }
  0xfb   :  { %v148_v44 = vmax.f32 %v145_v42, 0.0 }
  0xfd   :  { %283 = vmatmul.mubr.f32.vlgmr.msra.gmra.mxu1 %v148_v44 }
 0x1bd   :  { %v219_v46 = vpop.f32.mrf.mxu1 }
 0x1be   :  { %v220_v47 = vadd.f32 %v232_v45, %v219_v46 }
 0x1bf   :  { %v284_v48 = vpop.f32.mrf.mxu1 }
 0x1c0   :  { %223 = vst [vmem:[%s384_s2] sm:$0xff] %v220_v47 }
 0x1c1   :  { %228 = vsyncpa [#allocation3], 1 }

</bundles_post_ra>
